<compile_context>
chip_gen: v5e
topology: v5e:2x2
jax: 0.10.0
libtpu: 0.0.40
codegen_flags: <defaults>
</compile_context>

<pallas_src>
import jax
import jax.numpy as jnp
from jax.experimental import pallas as pl
from jax.experimental.pallas import tpu as pltpu

LANE = 128
SUBLANE = 8
MAX_BATCH_TILE = 2048                  # absolute cap on rows per grid step
X_TILE_VMEM_BUDGET = 12 * 1024 * 1024  # budget for the double-buffered f32 x tile


def _round_up(x, m):
    return (x + m - 1) // m * m


def _pick_batch_tile(B, F):
    """Rows per grid step: VMEM-budgeted, sublane-aligned, >=4 tiles for big B."""
    # Dominant VMEM allocation is the double-buffered f32 x tile: 2 * TB * F * 4 bytes.
    tb_budget = (X_TILE_VMEM_BUDGET // (2 * F * 4)) // SUBLANE * SUBLANE
    tb_budget = max(SUBLANE, min(tb_budget, MAX_BATCH_TILE))
    # Aim for >= 4 grid steps so the 'parallel' batch axis feeds both v7x TensorCores.
    tb_target = _round_up(-(-B // 4), SUBLANE)
    return max(SUBLANE, min(tb_budget, tb_target))


def _mlp_kernel(x_ref, w1_ref, b1_ref, w2_ref, b2_ref, out_ref):
    # x_ref:  [TB, F] f32    w1_ref: [F, H]  bf16   b1_ref: [1, H]  f32
    # w2_ref: [H, Cp] bf16   b2_ref: [1, Cp] f32    out_ref: [TB, Cp] f32
    # In-kernel bf16 cast of x (VPU, free in the mem-bound regime) keeps HBM x
    # traffic at 4 B/elem instead of the 8 B/elem a wrapper-side cast would cost.
    x_bf = x_ref[...].astype(jnp.bfloat16)
    h = jnp.dot(x_bf, w1_ref[...], preferred_element_type=jnp.float32)
    h = jnp.maximum(h + b1_ref[...], 0.0)                       # f32 bias + ReLU on VPU
    logits = jnp.dot(h.astype(jnp.bfloat16), w2_ref[...],
                     preferred_element_type=jnp.float32)        # bf16 MXU, f32 accum
    out_ref[...] = (logits + b2_ref[...]).astype(out_ref.dtype)  # lane-dense (Cp=128) store


def basic_net_forward(params, x_nchw):
    """Pallas-backed basic_net: returns (logits[B, n_classes], hidden_placeholder=None)."""
    w1, b1, w2p, b2p = params["w1"], params["b1"], params["w2"], params["b2"]
    n_classes = params["n_classes"]

    B = x_nchw.shape[0]
    F = w1.shape[0]
    H = w1.shape[1]
    Cp = w2p.shape[1]   # lane-padded class dim (multiple of 128)

    # Row-major flatten over C,H,W == torch.flatten(x, 1). No batch pad, no dtype
    # cast here — both would force an extra full pass of x through HBM.
    x_flat = x_nchw.reshape(B, F)

    TB = _pick_batch_tile(B, F)
    grid_b = pl.cdiv(B, TB)   # last block may be partial: loads padded, stores masked

    flops = 2 * B * (F * H + H * Cp)
    bytes_accessed = (x_flat.size * 4 + w1.size * 2 + b1.size * 4
                      + w2p.size * 2 + b2p.size * 4 + B * Cp * 4)
    cost = pl.CostEstimate(flops=flops, transcendentals=0,
                           bytes_accessed=bytes_accessed)

    logits_padded = pl.pallas_call(
        _mlp_kernel,
        out_shape=jax.ShapeDtypeStruct((B, Cp), jnp.float32),
        grid=(grid_b,),
        in_specs=[
            pl.BlockSpec((TB, F), lambda i: (i, 0)),   # x: tiled over the batch
            pl.BlockSpec((F, H), lambda i: (0, 0)),    # w1: resident (constant index)
            pl.BlockSpec((1, H), lambda i: (0, 0)),    # b1
            pl.BlockSpec((H, Cp), lambda i: (0, 0)),   # w2 (lane-padded classes)
            pl.BlockSpec((1, Cp), lambda i: (0, 0)),   # b2
        ],
        out_specs=pl.BlockSpec((TB, Cp), lambda i: (i, 0)),
        compiler_params=pltpu.CompilerParams(
            dimension_semantics=("parallel",),          # shards batch tiles across TCs
            vmem_limit_bytes=32 * 1024 * 1024),
        cost_estimate=cost,
    )(x_flat, w1, b1, w2p, b2p)

    # Strip only the lane-padding of the class dim (no batch padding was added).
    return logits_padded[:, :n_classes], None


class AttackNone:
    """JAX port of Attack_None: forwards through basic_net, ignores targets."""

    def __init__(self, params, config):
        self.train_flag = True if "train" not in config else config["train"]
        self.params = params
        print(config)

    def forward(self, inputs, targets, attack=None, batch_idx=-1):
        # TODO(synk): basic_net.train()/eval() switching is a no-op for this
        # stateless net (no dropout / batch-norm state to toggle).
        outputs, _ = basic_net_forward(self.params, inputs)
        return outputs, None


def init_params(key, in_features, hidden, n_classes):
    """Returns (kernel params with pre-cast bf16 weights, f32 masters for reference)."""
    k1, k2 = jax.random.split(key)
    w1 = (jax.random.normal(k1, (in_features, hidden), jnp.float32)
          * (1.0 / jnp.sqrt(in_features)))
    b1 = jnp.zeros((1, hidden), jnp.float32)
    w2 = (jax.random.normal(k2, (hidden, n_classes), jnp.float32)
          * (1.0 / jnp.sqrt(hidden)))
    b2 = jnp.zeros((1, n_classes), jnp.float32)

    # Lane-dense padding of the class dimension (10 -> 128): zero columns do not
    # change the first n_classes logits and are sliced off in the wrapper.
    c_pad = _round_up(n_classes, LANE)
    w2p = jnp.pad(w2, ((0, 0), (0, c_pad - n_classes)))
    b2p = jnp.pad(b2, ((0, 0), (0, c_pad - n_classes)))

    params = {
        "w1": w1.astype(jnp.bfloat16),    # cast once here, not per forward call
        "b1": b1,
        "w2": w2p.astype(jnp.bfloat16),   # bf16 second matmul on the MXU
        "b2": b2p,
        "n_classes": n_classes,
    }
    masters = {"w1": w1, "b1": b1, "w2": w2, "b2": b2}
    return params, masters


if __name__ == "__main__":
    # Small SVHN-like shapes: batch=2, channels=4, spatial=16x16, 10 classes.
    B, C_in, HW = 2, 4, 16
    HIDDEN, N_CLASSES = 128, 10
    F = C_in * HW * HW

    key = jax.random.PRNGKey(0)
    k_x, k_p = jax.random.split(key)

    inputs = jax.random.normal(k_x, (B, C_in, HW, HW), jnp.float32)   # NCHW
    targets = jax.random.randint(k_p, (B,), 0, N_CLASSES)             # ignored

    params, masters = init_params(k_p, F, HIDDEN, N_CLASSES)
    attack = AttackNone(params, config={"train": False})

    outputs, none_out = attack.forward(inputs, targets)
    outputs = jax.block_until_ready(outputs)

    assert outputs.shape == (B, N_CLASSES)
    assert none_out is None

    # Reference check against plain f32 JAX; the kernel uses bf16 matmul inputs
    # (x, w1, h, w2) with f32 accumulation, so use a correspondingly loose tolerance.
    ref = (jnp.maximum(inputs.reshape(B, F) @ masters["w1"] + masters["b1"], 0.0)
           @ masters["w2"] + masters["b2"])
    assert jnp.allclose(outputs, ref, atol=3e-2, rtol=3e-2), (
        float(jnp.max(jnp.abs(outputs - ref))))

    print("KERNEL_OK")
</pallas_src>

<mosaic_0001>
module attributes {stable_mosaic.version = 11 : i64} {
  func.func @_mlp_kernel(%arg0: i32, %arg1: memref<8x1024xf32, #tpu.memory_space<vmem>>, %arg2: memref<1024x128xbf16, #tpu.memory_space<vmem>>, %arg3: memref<1x128xf32, #tpu.memory_space<vmem>>, %arg4: memref<128x128xbf16, #tpu.memory_space<vmem>>, %arg5: memref<1x128xf32, #tpu.memory_space<vmem>>, %arg6: memref<8x128xf32, #tpu.memory_space<vmem>>) attributes {dimension_semantics = [#tpu.dimension_semantics<parallel>], iteration_bounds = array<i64: 1>, scalar_prefetch = 0 : i64, scratch_operands = 0 : i64, tpu.core_type = #tpu.core_type<tc>, window_params = [{transform_indices = @transform_0, window_bounds = array<i64: 8, 1024>}, {pipeline_mode = #tpu.pipeline_mode<synchronous>, transform_indices = @transform_1, window_bounds = array<i64: 1024, 128>}, {pipeline_mode = #tpu.pipeline_mode<synchronous>, transform_indices = @transform_2, window_bounds = array<i64: 1, 128>}, {pipeline_mode = #tpu.pipeline_mode<synchronous>, transform_indices = @transform_3, window_bounds = array<i64: 128, 128>}, {pipeline_mode = #tpu.pipeline_mode<synchronous>, transform_indices = @transform_4, window_bounds = array<i64: 1, 128>}, {transform_indices = @transform_5, window_bounds = array<i64: 8, 128>}]} {
    %c0 = arith.constant 0 : index
    %c0_0 = arith.constant 0 : index
    %0 = vector.load %arg1[%c0, %c0_0] : memref<8x1024xf32, #tpu.memory_space<vmem>>, vector<8x1024xf32>
    %1 = arith.truncf %0 : vector<8x1024xf32> to vector<8x1024xbf16>
    %c0_1 = arith.constant 0 : index
    %c0_2 = arith.constant 0 : index
    %2 = vector.load %arg2[%c0_1, %c0_2] : memref<1024x128xbf16, #tpu.memory_space<vmem>>, vector<1024x128xbf16>
    %cst = arith.constant dense<0.000000e+00> : vector<8x128xf32>
    %3 = tpu.matmul %1, %2, %cst {dimension_numbers = #tpu.dot_dimension_numbers<[1], [0], [0], [1], [0, 0, 1, 1], [], []>} : vector<8x1024xbf16>, vector<1024x128xbf16>, vector<8x128xf32> -> vector<8x128xf32>
    %c0_3 = arith.constant 0 : index
    %c0_4 = arith.constant 0 : index
    %4 = vector.load %arg3[%c0_3, %c0_4] : memref<1x128xf32, #tpu.memory_space<vmem>>, vector<1x128xf32>
    %5 = vector.broadcast %4 : vector<1x128xf32> to vector<8x128xf32>
    %6 = arith.addf %3, %5 : vector<8x128xf32>
    %cst_5 = arith.constant 0.000000e+00 : f32
    %7 = vector.broadcast %cst_5 : f32 to vector<8x128xf32>
    %8 = arith.maximumf %6, %7 : vector<8x128xf32>
    %9 = arith.truncf %8 : vector<8x128xf32> to vector<8x128xbf16>
    %c0_6 = arith.constant 0 : index
    %c0_7 = arith.constant 0 : index
    %10 = vector.load %arg4[%c0_6, %c0_7] : memref<128x128xbf16, #tpu.memory_space<vmem>>, vector<128x128xbf16>
    %cst_8 = arith.constant dense<0.000000e+00> : vector<8x128xf32>
    %11 = tpu.matmul %9, %10, %cst_8 {dimension_numbers = #tpu.dot_dimension_numbers<[1], [0], [0], [1], [0, 0, 1, 1], [], []>} : vector<8x128xbf16>, vector<128x128xbf16>, vector<8x128xf32> -> vector<8x128xf32>
    %c0_9 = arith.constant 0 : index
    %c0_10 = arith.constant 0 : index
    %12 = vector.load %arg5[%c0_9, %c0_10] : memref<1x128xf32, #tpu.memory_space<vmem>>, vector<1x128xf32>
    %13 = vector.broadcast %12 : vector<1x128xf32> to vector<8x128xf32>
    %14 = arith.addf %11, %13 : vector<8x128xf32>
    %c0_11 = arith.constant 0 : index
    %c0_12 = arith.constant 0 : index
    %15 = vector.load %arg6[%c0_11, %c0_12] : memref<8x128xf32, #tpu.memory_space<vmem>>, vector<8x128xf32>
    tpu.vector_store %arg6[%c0_11, %c0_12], %14 {strides = array<i32>} : memref<8x128xf32, #tpu.memory_space<vmem>>, vector<8x128xf32>,
    return
  }
  func.func @transform_0(%arg0: i32) -> (i32, i32) {
    %c0_i32 = arith.constant 0 : i32
    %c0_i32_0 = arith.constant 0 : i32
    return %arg0, %c0_i32 : i32, i32
  }
  func.func @transform_1(%arg0: i32) -> (i32, i32) {
    %c0_i32 = arith.constant 0 : i32
    %c0_i32_0 = arith.constant 0 : i32
    %c0_i32_1 = arith.constant 0 : i32
    return %c0_i32, %c0_i32_0 : i32, i32
  }
  func.func @transform_2(%arg0: i32) -> (i32, i32) {
    %c0_i32 = arith.constant 0 : i32
    %c0_i32_0 = arith.constant 0 : i32
    %c0_i32_1 = arith.constant 0 : i32
    return %c0_i32, %c0_i32_0 : i32, i32
  }
  func.func @transform_3(%arg0: i32) -> (i32, i32) {
    %c0_i32 = arith.constant 0 : i32
    %c0_i32_0 = arith.constant 0 : i32
    %c0_i32_1 = arith.constant 0 : i32
    return %c0_i32, %c0_i32_0 : i32, i32
  }
  func.func @transform_4(%arg0: i32) -> (i32, i32) {
    %c0_i32 = arith.constant 0 : i32
    %c0_i32_0 = arith.constant 0 : i32
    %c0_i32_1 = arith.constant 0 : i32
    return %c0_i32, %c0_i32_0 : i32, i32
  }
  func.func @transform_5(%arg0: i32) -> (i32, i32) {
    %c0_i32 = arith.constant 0 : i32
    %c0_i32_0 = arith.constant 0 : i32
    return %arg0, %c0_i32 : i32, i32
  }
}

</mosaic_0001>

<bundles_post_ra>
// kernel: tpu_custom_call.1
= control target key start
LH: loop header
LB: loop body
LE: loop exit
PB: predicated region body
PF: predicated region fallthrough
CT: control target
= control target key end

     0   :  { %10 = vsyncpa [#allocation3], 0  ;;  %s1379_s0 = inlined_call_operand.hbm [shape: f32[2,1024], index: 0, kind: input, shape index: {}]   ;;  %s1380_s1 = inlined_call_operand.hbm [shape: bf16[1024,128], index: 1, kind: input, shape index: {}]   ;;  %s1381_s2 = inlined_call_operand.vmem [shape: f32[1,128], index: 2, kind: input, shape index: {}]   ;;  %s1382_s3 = inlined_call_operand.hbm [shape: bf16[128,128], index: 3, kind: input, shape index: {}]   ;;  %s1383_s4 = inlined_call_operand.vmem [shape: f32[1,128], index: 4, kind: input, shape index: {}]   ;;  %s1384_s5 = inlined_call_operand.hbm [shape: f32[2,128], index: 5, kind: output, shape index: {}]  }
   0x1   :  { %11 = vsyncpa [#allocation6], 0 }
   0x2   :  { %12 = vsyncpa [#allocation4], 0  ;;  %s30_s20 = sshll.u32 %s1380_s1, 4  ;;  %s31_s20 = int_to_ptr.hbm [resolvable:$true] %s30_s20 }
   0x3   :  { %16 = vsyncadd [#allocation3], 768  ;;  %s1321_s21 = smov [#allocation5]   ;;  %s17_s25 = sshll.u32 %s1379_s0, 4  ;;  %s18_s25 = int_to_ptr.hbm [resolvable:$true] %s17_s25 }
   0x4   :  { %s32_s22 = sshll.u32 %s1321_s21, 4  ;;  %s1322_s26 = smov 64   ;;  %s33_s22 = int_to_ptr.vmem [resolvable:$true] %s32_s22 }
   0x5   :  { %s1323_s27 = smov 4   ;;  %s1324_s28 = smov [#allocation2]  }
   0x6   :  { %38 = dma.hbm_to_vmem [thread:$0]  %s31_s20, 8192, %s33_s22, [#allocation6], %s1322_s26, %s1322_s26, %s1323_s27  }
   0x7   :  { %s19_s29 = sshll.u32 %s1324_s28, 4  ;;  %s1325_s30 = smov 256   ;;  %s20_s29 = int_to_ptr.vmem [resolvable:$true] %s19_s29 }
   0x8   :  { %s1326_s6 = smov 16   ;;  %s45_s8 = sshll.u32 %s1382_s3, 4  ;;  %s46_s8 = int_to_ptr.hbm [resolvable:$true] %s45_s8 }
   0x9   :  { %25 = dma.hbm_to_vmem [thread:$0]  %s18_s25, 256, %s20_s29, [#allocation3], %s1325_s30, %s1325_s30, %s1326_s6  }
   0xa   :  { %s1327_s9 = smov [#allocation7]  }
   0xb   :  { %s47_s10 = sshll.u32 %s1327_s9, 4  ;;  %s48_s10 = int_to_ptr.vmem [resolvable:$true] %s47_s10 }
   0xc   :  { %53 = dma.hbm_to_vmem [thread:$0]  %s46_s8, 1024, %s48_s10, [#allocation6], %s1322_s26, %s1322_s26, %s1323_s27  }
   0xd   :  { %1315 = dma.done.wait [#allocation3], 1024  }
   0xe   :  { %1316 = vsyncadd [#allocation3], 4294966272 }
   0xf   :  { %1317 = dma.done.wait [#allocation6], 9216  }
  0x10   :  { %1318 = vsyncadd [#allocation6], 4294958080  ;;  %v1142_v0 = vld [vmem:[#allocation5 + $0x38] sm:$0xff]  ;;  %v1141_v4 = vld [vmem:[#allocation5 + $0x30] sm:$0xff] }
  0x11   :  { %v1150_v1 = vld [vmem:[#allocation5 + $0x78] sm:$0xff]  ;;  %639 = vmatpush.bf16.msra.mxu0 %v1142_v0  ;;  %v1149_v5 = vld [vmem:[#allocation5 + $0x70] sm:$0xff]  ;;  %v1140_v8 = vld [vmem:[#allocation5 + $0x28] sm:$0xff] }
  0x12   :  { %v1158_v2 = vld [vmem:[#allocation5 + $0xb8] sm:$0xff]  ;;  %652 = vmatpush.bf16.msra.mxu1 %v1150_v1  ;;  %v1157_v6 = vld [vmem:[#allocation5 + $0xb0] sm:$0xff]  ;;  %v1148_v9 = vld [vmem:[#allocation5 + $0x68] sm:$0xff] }
  0x13   :  { %v1166_v3 = vld [vmem:[#allocation5 + $0xf8] sm:$0xff]  ;;  %665 = vmatpush.bf16.msra.mxu2 %v1158_v2  ;;  %v1165_v7 = vld [vmem:[#allocation5 + $0xf0] sm:$0xff]  ;;  %v1156_v10 = vld [vmem:[#allocation5 + $0xa8] sm:$0xff] }
  0x14   :  { %678 = vmatpush.bf16.msra.mxu3 %v1166_v3  ;;  %v1164_v11 = vld [vmem:[#allocation5 + $0xe8] sm:$0xff]  ;;  %v1139_v12 = vld [vmem:[#allocation5 + $0x20] sm:$0xff]  ;;  %v1138_v16 = vld [vmem:[#allocation5 + $0x18] sm:$0xff] }
  0x15   :  { %640 = vmatpush.bf16.msra.mxu0 %v1141_v4  ;;  %v1147_v13 = vld [vmem:[#allocation5 + $0x60] sm:$0xff]  ;;  %v70_v18 = vld [vmem:[#allocation2 + $0x10] sm:$0xff]  ;;  %v1146_v19 = vld [vmem:[#allocation5 + $0x58] sm:$0xff] }
  0x16   :  { %653 = vmatpush.bf16.msra.mxu1 %v1149_v5  ;;  %v1155_v14 = vld [vmem:[#allocation5 + $0xa0] sm:$0xff]  ;;  %v74_v21 = vld [vmem:[#allocation2 + $0x30] sm:$0xff]  ;;  %v1154_v22 = vld [vmem:[#allocation5 + $0x98] sm:$0xff]  ;;  %86 = vst [vmem:[#allocation1 + $0x1] ss:$4 sm:$0xff] %v70_v18 }
  0x17   :  { %666 = vmatpush.bf16.msra.mxu2 %v1157_v6  ;;  %v1163_v15 = vld [vmem:[#allocation5 + $0xe0] sm:$0xff]  ;;  %v1162_v23 = vld [vmem:[#allocation5 + $0xd8] sm:$0xff]  ;;  %90 = vst [vmem:[#allocation1 + $0x3] ss:$4 sm:$0xff] %v74_v21  ;;  %v1137_v24 = vld [vmem:[#allocation5 + $0x10] sm:$0xff] }
  0x18   :  { %679 = vmatpush.bf16.msra.mxu3 %v1165_v7  ;;  %v68_v17 = vld [vmem:[#allocation2] sm:$0xff]  ;;  %v1145_v25 = vld [vmem:[#allocation5 + $0x50] sm:$0xff]  ;;  %v69_v28 = vld [vmem:[#allocation2 + $0x8] sm:$0xff] }
  0x19   :  { %641 = vmatpush.bf16.msra.mxu0 %v1140_v8  ;;  %v72_v20 = vld [vmem:[#allocation2 + $0x20] sm:$0xff]  ;;  %84 = vst [vmem:[#allocation1] ss:$4 sm:$0xff] %v68_v17  ;;  %v1153_v26 = vld [vmem:[#allocation5 + $0x90] sm:$0xff]  ;;  %v71_v29 = vld [vmem:[#allocation2 + $0x18] sm:$0xff] }
  0x1a   :  { %654 = vmatpush.bf16.msra.mxu1 %v1148_v9  ;;  %88 = vst [vmem:[#allocation1 + $0x2] ss:$4 sm:$0xff] %v72_v20  ;;  %v1161_v27 = vld [vmem:[#allocation5 + $0xd0] sm:$0xff]  ;;  %v1136_v30 = vld [vmem:[#allocation5 + $0x8] sm:$0xff]  ;;  %v1135_v35 = vld [vmem:[#allocation5] sm:$0xff] }
  0x1b   :  { %667 = vmatpush.bf16.msra.mxu2 %v1156_v10  ;;  %v1144_v31 = vld [vmem:[#allocation5 + $0x48] sm:$0xff]  ;;  %92 = vst [vmem:[#allocation1 + $0x20] ss:$4 sm:$0xff] %v69_v28  ;;  %v75_v36 = vld [vmem:[#allocation2 + $0x38] sm:$0xff]  ;;  %v1143_v37 = vld [vmem:[#allocation5 + $0x40] sm:$0xff] }
  0x1c   :  { %680 = vmatpush.bf16.msra.mxu3 %v1164_v11  ;;  %v1152_v32 = vld [vmem:[#allocation5 + $0x88] sm:$0xff]  ;;  %94 = vst [vmem:[#allocation1 + $0x21] ss:$4 sm:$0xff] %v71_v29  ;;  %v1151_v38 = vld [vmem:[#allocation5 + $0x80] sm:$0xff]  ;;  %v1174_v40 = vld [vmem:[#allocation5 + $0x138] sm:$0xff] }
  0x1d   :  { %642 = vmatpush.bf16.msra.mxu0 %v1139_v12  ;;  %v1160_v33 = vld [vmem:[#allocation5 + $0xc8] sm:$0xff]  ;;  %v1159_v39 = vld [vmem:[#allocation5 + $0xc0] sm:$0xff]  ;;  %v1182_v42 = vld [vmem:[#allocation5 + $0x178] sm:$0xff]  ;;  %98 = vst [vmem:[#allocation1 + $0x23] ss:$4 sm:$0xff] %v75_v36 }
  0x1e   :  { %655 = vmatpush.bf16.msra.mxu1 %v1147_v13  ;;  %v73_v34 = vld [vmem:[#allocation2 + $0x28] sm:$0xff]  ;;  %v1190_v46 = vld [vmem:[#allocation5 + $0x1b8] sm:$0xff]  ;;  %v1173_v52 = vld [vmem:[#allocation5 + $0x130] sm:$0xff] }
  0x1f   :  { %668 = vmatpush.bf16.msra.mxu2 %v1155_v14  ;;  %96 = vst [vmem:[#allocation1 + $0x22] ss:$4 sm:$0xff] %v73_v34  ;;  %v1198_v47 = vld [vmem:[#allocation5 + $0x1f8] sm:$0xff]  ;;  %v1181_v53 = vld [vmem:[#allocation5 + $0x170] sm:$0xff]  ;;  %v1172_v56 = vld [vmem:[#allocation5 + $0x128] sm:$0xff] }
  0x20   :  { %681 = vmatpush.bf16.msra.mxu3 %v1163_v15  ;;  %v1189_v54 = vld [vmem:[#allocation5 + $0x1b0] sm:$0xff]  ;;  %v1180_v57 = vld [vmem:[#allocation5 + $0x168] sm:$0xff]  ;;  %v1171_v60 = vld [vmem:[#allocation5 + $0x120] sm:$0xff] }
  0x21   :  { %643 = vmatpush.bf16.msra.mxu0 %v1138_v16  ;;  %v101_v41 = vld.sshfl [vmem:[#allocation1 + $0x10] sm:$0xff pattern:$0x73625140]  ;;  %v99_v43 = vld.sshfl [vmem:[#allocation1] sm:$0xff pattern:$0x73625140] }
  0x22   :  { %656 = vmatpush.bf16.msra.mxu1 %v1146_v19  ;;  %v102_v44 = vld.sshfl [vmem:[#allocation1 + $0x18] sm:$0xff pattern:$0x73625140]  ;;  %v100_v45 = vld.sshfl [vmem:[#allocation1 + $0x8] sm:$0xff pattern:$0x73625140]  ;;  %v117_v48 = vpack.c.bf16 %v101_v41, %v101_v41  ;;  %v115_v49 = vpack.c.bf16 %v99_v43, %v99_v43 }
  0x23   :  { %669 = vmatpush.bf16.msra.mxu2 %v1154_v22  ;;  %v118_v50 = vpack.c.bf16 %v102_v44, %v102_v44  ;;  %v116_v51 = vpack.c.bf16 %v100_v45, %v100_v45  ;;  %v1197_v55 = vld [vmem:[#allocation5 + $0x1f0] sm:$0xff]  ;;  %v1188_v58 = vld [vmem:[#allocation5 + $0x1a8] sm:$0xff]  ;;  %v1179_v61 = vld [vmem:[#allocation5 + $0x160] sm:$0xff] }
  0x24   :  { %682 = vmatpush.bf16.msra.mxu3 %v1162_v23  ;;  %v1196_v59 = vld [vmem:[#allocation5 + $0x1e8] sm:$0xff]  ;;  %v1187_v62 = vld [vmem:[#allocation5 + $0x1a0] sm:$0xff]  ;;  %v1170_v0 = vld [vmem:[#allocation5 + $0x118] sm:$0xff] }
  0x25   :  { %644 = vmatpush.bf16.msra.mxu0 %v1137_v24  ;;  %v1195_v63 = vld [vmem:[#allocation5 + $0x1e0] sm:$0xff]  ;;  %v1178_v1 = vld [vmem:[#allocation5 + $0x158] sm:$0xff]  ;;  %v1169_v4 = vld [vmem:[#allocation5 + $0x110] sm:$0xff] }
  0x26   :  { %657 = vmatpush.bf16.msra.mxu1 %v1145_v25  ;;  %v1186_v2 = vld [vmem:[#allocation5 + $0x198] sm:$0xff]  ;;  %v1177_v5 = vld [vmem:[#allocation5 + $0x150] sm:$0xff]  ;;  %v1168_v8 = vld [vmem:[#allocation5 + $0x108] sm:$0xff] }
  0x27   :  { %670 = vmatpush.bf16.msra.mxu2 %v1153_v26  ;;  %v1194_v3 = vld [vmem:[#allocation5 + $0x1d8] sm:$0xff]  ;;  %v1185_v6 = vld [vmem:[#allocation5 + $0x190] sm:$0xff]  ;;  %v1176_v9 = vld [vmem:[#allocation5 + $0x148] sm:$0xff] }
  0x28   :  { %683 = vmatpush.bf16.msra.mxu3 %v1161_v27  ;;  %v1193_v7 = vld [vmem:[#allocation5 + $0x1d0] sm:$0xff]  ;;  %v1184_v10 = vld [vmem:[#allocation5 + $0x188] sm:$0xff]  ;;  %v1167_v12 = vld [vmem:[#allocation5 + $0x100] sm:$0xff] }
  0x29   :  { %645 = vmatpush.bf16.msra.mxu0 %v1136_v30  ;;  %v1192_v11 = vld [vmem:[#allocation5 + $0x1c8] sm:$0xff]  ;;  %v1175_v13 = vld [vmem:[#allocation5 + $0x140] sm:$0xff]  ;;  %v103_v16 = vld.sshfl [vmem:[#allocation1 + $0x20] sm:$0xff pattern:$0x73625140] }
  0x2a   :  { %658 = vmatpush.bf16.msra.mxu1 %v1144_v31  ;;  %v1183_v14 = vld [vmem:[#allocation5 + $0x180] sm:$0xff]  ;;  %v105_v18 = vld.sshfl [vmem:[#allocation1 + $0x30] sm:$0xff pattern:$0x73625140]  ;;  %v119_v20 = vpack.c.bf16 %v103_v16, %v103_v16  ;;  %v1206_v24 = vld [vmem:[#allocation7 + $0x38] sm:$0xff] }
  0x2b   :  { %671 = vmatpush.bf16.msra.mxu2 %v1152_v32  ;;  %v1191_v15 = vld [vmem:[#allocation5 + $0x1c0] sm:$0xff]  ;;  %v106_v19 = vld.sshfl [vmem:[#allocation1 + $0x38] sm:$0xff pattern:$0x73625140]  ;;  %v121_v22 = vpack.c.bf16 %v105_v18, %v105_v18  ;;  %v1204_v26 = vld [vmem:[#allocation7 + $0x28] sm:$0xff] }
  0x2c   :  { %684 = vmatpush.bf16.msra.mxu3 %v1160_v33  ;;  %v104_v17 = vld.sshfl [vmem:[#allocation1 + $0x28] sm:$0xff pattern:$0x73625140]  ;;  %v122_v23 = vpack.c.bf16 %v106_v19, %v106_v19  ;;  %v1205_v25 = vld [vmem:[#allocation7 + $0x30] sm:$0xff]  ;;  %v1202_v28 = vld [vmem:[#allocation7 + $0x18] sm:$0xff] }
  0x2d   :  { %646 = vmatpush.bf16.msra.mxu0 %v1135_v35  ;;  %v120_v21 = vpack.c.bf16 %v104_v17, %v104_v17  ;;  %v1203_v27 = vld [vmem:[#allocation7 + $0x20] sm:$0xff]  ;;  %v1201_v30 = vld [vmem:[#allocation7 + $0x10] sm:$0xff]  ;;  %v1200_v32 = vld [vmem:[#allocation7 + $0x8] sm:$0xff] }
  0x2e   :  { %659 = vmatpush.bf16.msra.mxu1 %v1143_v37  ;;  %v1199_v36 = vld [vmem:[#allocation7] sm:$0xff] }
  0x2f   :  { %672 = vmatpush.bf16.msra.mxu2 %v1151_v38  ;;  %v1217_v38 = vld [vmem:[%s1381_s2] ss:$0 sm:$0xff] }
  0x30   :  { %685 = vmatpush.bf16.msra.mxu3 %v1159_v39  ;;  %647 = vmatmul.bf16.vlgmr.msra.gmra.mxu0 %v115_v49 }
  0x31   :  { %691 = vmatpush.bf16.msrb.mxu0 %v1174_v40  ;;  %660 = vmatmul.bf16.vlgmr.msra.gmra.mxu1 %v116_v51 }
  0x32   :  { %704 = vmatpush.bf16.msrb.mxu1 %v1182_v42  ;;  %673 = vmatmul.bf16.vlgmr.msra.gmra.mxu2 %v117_v48 }
  0x33   :  { %717 = vmatpush.bf16.msrb.mxu2 %v1190_v46  ;;  %686 = vmatmul.bf16.vlgmr.msra.gmra.mxu3 %v118_v50 }
  0x34   :  { %730 = vmatpush.bf16.msrb.mxu3 %v1198_v47 }
  0x35   :  { %692 = vmatpush.bf16.msrb.mxu0 %v1173_v52 }
  0x36   :  { %705 = vmatpush.bf16.msrb.mxu1 %v1181_v53 }
  0x37   :  { %718 = vmatpush.bf16.msrb.mxu2 %v1189_v54 }
  0x38   :  { %731 = vmatpush.bf16.msrb.mxu3 %v1197_v55 }
  0x39   :  { %693 = vmatpush.bf16.msrb.mxu0 %v1172_v56 }
  0x3a   :  { %706 = vmatpush.bf16.msrb.mxu1 %v1180_v57 }
  0x3b   :  { %719 = vmatpush.bf16.msrb.mxu2 %v1188_v58 }
  0x3c   :  { %732 = vmatpush.bf16.msrb.mxu3 %v1196_v59  ;;  %v1218_v59 = vld [vmem:[%s1383_s4] ss:$0 sm:$0xff] }
  0x3d   :  { %694 = vmatpush.bf16.msrb.mxu0 %v1171_v60 }
  0x3e   :  { %707 = vmatpush.bf16.msrb.mxu1 %v1179_v61 }
  0x3f   :  { %720 = vmatpush.bf16.msrb.mxu2 %v1187_v62 }
  0x40   :  { %733 = vmatpush.bf16.msrb.mxu3 %v1195_v63 }
  0x41   :  { %695 = vmatpush.bf16.msrb.mxu0 %v1170_v0 }
  0x42   :  { %708 = vmatpush.bf16.msrb.mxu1 %v1178_v1 }
  0x43   :  { %721 = vmatpush.bf16.msrb.mxu2 %v1186_v2 }
  0x44   :  { %734 = vmatpush.bf16.msrb.mxu3 %v1194_v3 }
  0x45   :  { %696 = vmatpush.bf16.msrb.mxu0 %v1169_v4 }
  0x46   :  { %709 = vmatpush.bf16.msrb.mxu1 %v1177_v5 }
  0x47   :  { %722 = vmatpush.bf16.msrb.mxu2 %v1185_v6 }
  0x48   :  { %735 = vmatpush.bf16.msrb.mxu3 %v1193_v7 }
  0x49   :  { %697 = vmatpush.bf16.msrb.mxu0 %v1168_v8 }
  0x4a   :  { %710 = vmatpush.bf16.msrb.mxu1 %v1176_v9 }
  0x4b   :  { %723 = vmatpush.bf16.msrb.mxu2 %v1184_v10 }
  0x4c   :  { %736 = vmatpush.bf16.msrb.mxu3 %v1192_v11 }
  0x4d   :  { %698 = vmatpush.bf16.msrb.mxu0 %v1167_v12 }
  0x4e   :  { %711 = vmatpush.bf16.msrb.mxu1 %v1175_v13 }
  0x4f   :  { %724 = vmatpush.bf16.msrb.mxu2 %v1183_v14 }
  0x50   :  { %737 = vmatpush.bf16.msrb.mxu3 %v1191_v15  ;;  %699 = vmatmul.bf16.vlgmr.msrb.gmra.mxu0 %v119_v20 }
  0x51   :  { %712 = vmatmul.bf16.vlgmr.msrb.gmra.mxu1 %v120_v21  ;;  %813 = vmatpush.bf16.msra.mxu0 %v1206_v24 }
  0x52   :  { %725 = vmatmul.bf16.vlgmr.msrb.gmra.mxu2 %v121_v22 }
  0x53   :  { %738 = vmatmul.bf16.vlgmr.msrb.gmra.mxu3 %v122_v23 }
  0x55   :  { %814 = vmatpush.bf16.msra.mxu0 %v1205_v25 }
  0x59   :  { %815 = vmatpush.bf16.msra.mxu0 %v1204_v26 }
  0x5d   :  { %816 = vmatpush.bf16.msra.mxu0 %v1203_v27 }
  0x61   :  { %817 = vmatpush.bf16.msra.mxu0 %v1202_v28 }
  0x65   :  { %818 = vmatpush.bf16.msra.mxu0 %v1201_v30 }
  0x69   :  { %819 = vmatpush.bf16.msra.mxu0 %v1200_v32 }
  0x6d   :  { %820 = vmatpush.bf16.msra.mxu0 %v1199_v36 }
  0xad   :  { %v648_v29 = vpop.f32.mrf.mxu0 }
  0xae   :  { %v661_v31 = vpop.f32.mrf.mxu1  ;;  %v649_v41 = vadd.f32 %v1217_v38, %v648_v29 }
  0xb0   :  { %v662_v42 = vadd.f32 %v661_v31, %v649_v41 }
  0xb5   :  { %v674_v33 = vpop.f32.mrf.mxu2  ;;  %v650_v35 = vpop.f32.mrf.mxu0 }
  0xb6   :  { %v687_v34 = vpop.f32.mrf.mxu3  ;;  %v663_v37 = vpop.f32.mrf.mxu1  ;;  %v675_v43 = vadd.f32 %v674_v33, %v662_v42 }
  0xb8   :  { %v688_v44 = vadd.f32 %v687_v34, %v675_v43 }
  0xbd   :  { %v676_v39 = vpop.f32.mrf.mxu2 }
  0xbe   :  { %v689_v40 = vpop.f32.mrf.mxu3 }
  0xcd   :  { %v700_v45 = vpop.f32.mrf.mxu0 }
  0xce   :  { %v713_v46 = vpop.f32.mrf.mxu1  ;;  %v701_v47 = vadd.f32 %v700_v45, %v688_v44 }
  0xd0   :  { %v714_v48 = vadd.f32 %v713_v46, %v701_v47 }
  0xd5   :  { %v726_v49 = vpop.f32.mrf.mxu2  ;;  %v702_v52 = vpop.f32.mrf.mxu0 }
  0xd6   :  { %v739_v50 = vpop.f32.mrf.mxu3  ;;  %v727_v51 = vadd.f32 %v726_v49, %v714_v48  ;;  %v715_v53 = vpop.f32.mrf.mxu1 }
  0xd8   :  { %v740_v54 = vadd.f32 %v739_v50, %v727_v51 }
  0xda   :  { %v743_v55 = vmax.f32 %v740_v54, 0.0 }
  0xdc   :  { %v744_v56 = vpack.c.bf16 %v743_v55, %v743_v55 }
  0xdd   :  { %v728_v57 = vpop.f32.mrf.mxu2 }
  0xde   :  { %v741_v58 = vpop.f32.mrf.mxu3  ;;  %821 = vmatmul.bf16.vlgmr.msra.gmra.mxu0 %v744_v56 }
 0x15b   :  { %v822_v60 = vpop.f32.mrf.mxu0 }
 0x15c   :  { %v823_v61 = vadd.f32 %v1218_v59, %v822_v60 }
 0x15e   :  { %826 = vst [vmem:[#allocation8] sm:$0xff] %v823_v61 }
 0x163   :  { %v824_v62 = vpop.f32.mrf.mxu0 }
 0x164   :  { %830 = vsyncadd [#allocation4], 96  ;;  %s833_s14 = sshll.u32 %s1384_s5, 4  ;;  %s1328_s15 = smov [#allocation8]   ;;  %s834_s14 = int_to_ptr.hbm [resolvable:$true] %s833_s14 }
 0x165   :  { %s831_s16 = sshll.u32 %s1328_s15, 4  ;;  %s1329_s17 = smov 32   ;;  %s832_s16 = int_to_ptr.vmem [resolvable:$true] %s831_s16 }
 0x166   :  { %s1330_s18 = smov 2  }
 0x167   :  { %839 = dma.vmem_to_hbm [thread:$0]  %s832_s16, 32, %s834_s14, [#allocation4], %s1329_s17, %s1329_s17, %s1330_s18  }
 0x168   :  { %1319 = dma.done.wait [#allocation4], 128  }
 0x169   :  { %1320 = vsyncadd [#allocation4], 4294967168 }
 0x16a   :  { %844 = vsyncpa [#allocation3], 1 }
 0x16b   :  { %845 = vsyncpa [#allocation6], 1 }
 0x16c   :  { %846 = vsyncpa [#allocation4], 1 }

</bundles_post_ra>
